<compile_context>
chip_gen: v5e
topology: v5e:2x2
jax: 0.10.0
libtpu: 0.0.40
codegen_flags: <defaults>
</compile_context>

<pallas_src>
import functools

import jax
import jax.numpy as jnp
from jax import lax
from jax.experimental import pallas as pl
from jax.experimental.pallas import tpu as pltpu


def _round_up(x, m):
    return (x + m - 1) // m * m


def _multi_loss_kernel(*refs, smooth, eps, class_num, regularization,
                       batch, batch_tile):
    if regularization in (1, 2):
        logits_ref, tgt_ref, feat_ref, res_ref = refs
    else:
        logits_ref, tgt_ref, res_ref = refs
        feat_ref = None

    logits = logits_ref[...].astype(jnp.float32)          # (bt, C) batch on sublanes
    tgt = tgt_ref[...].astype(jnp.float32)                # (bt, C)

    # mask for the (possibly partial) trailing tile
    row0 = pl.program_id(0) * batch_tile
    rows = lax.broadcasted_iota(jnp.int32, (batch_tile, 1), 0) + row0
    valid = rows < batch                                   # (bt, 1)

    # numerically stable log-softmax over the class (lane) axis, folded:
    #   -(logpt*soft).sum(axis=1) = lse*sum(soft) - sum(soft*shifted)
    m = jnp.max(logits, axis=1, keepdims=True)             # (bt, 1)
    shifted = logits - m
    lse = jnp.log(jnp.sum(jnp.exp(shifted), axis=1, keepdims=True))   # (bt, 1)

    total = jnp.sum(tgt, axis=1, keepdims=True)            # (bt, 1)
    t_dot_s = jnp.sum(tgt * shifted, axis=1, keepdims=True)

    if smooth == 1:
        # soft = (1-eps)*t + eps*(1-t)*total/class_num, folded to per-row sums
        num_cols = tgt.shape[-1]
        scale = jnp.float32(eps / class_num)
        sum_shift = jnp.sum(shifted, axis=1, keepdims=True)
        sum_soft = (jnp.float32(1.0 - eps) * total
                    + scale * total * (jnp.float32(num_cols) - total))
        soft_dot_s = (jnp.float32(1.0 - eps) * t_dot_s
                      + scale * total * (sum_shift - t_dot_s))
    else:
        sum_soft = total
        soft_dot_s = t_dot_s

    ce = lse * sum_soft - soft_dot_s                        # (bt, 1)
    ce = jnp.where(valid, ce, 0.0)

    if regularization in (1, 2):
        f = feat_ref[...].astype(jnp.float32)               # (bt, D)
        d = jnp.abs(f) - 1.0
        if regularization == 1:
            reg = jnp.sum(jnp.abs(d), axis=1, keepdims=True)
        else:
            reg = jnp.sum(d * d, axis=1, keepdims=True)
        reg = jnp.where(valid, reg, 0.0)
        res_ref[:, 0:1] = ce
        res_ref[:, 1:2] = reg
    else:
        res_ref[...] = ce


def multi_loss(features, output, target, *, class_num=21, smooth=0, eps=0.0,
               regularization=0, lam=0.5, batch_tile=None):
    """Pallas implementation of Multi_Loss.forward. Returns a scalar float32."""
    B, C = output.shape
    assert target.shape == (B, C)
    D = features.shape[1]
    use_reg = regularization in (1, 2)

    # ---- pick a large batch tile (rows) under a ~24 MiB double-buffered
    #      VMEM budget; account for (8,128) lane padding of the narrow blocks.
    if batch_tile is None:
        lane_c = _round_up(C, 128)
        lane_d = _round_up(D, 128) if use_reg else 0
        vmem_per_row = 4 * (2 * lane_c + lane_d + 128)   # inputs + output block
        budget = 24 << 20
        batch_tile = 256
        for cand in (16384, 8192, 4096, 2048, 1024, 512, 256):
            if 2 * cand * vmem_per_row <= budget:
                batch_tile = cand
                break
    batch_tile = min(batch_tile, _round_up(B, 8))
    if B >= 256:
        # v7x megacore: make sure the parallel grid has at least 2 steps
        batch_tile = min(batch_tile, _round_up(pl.cdiv(B, 2), 8))
    batch_tile = max(8, _round_up(batch_tile, 8))

    grid = (pl.cdiv(B, batch_tile),)

    ins = [output, target]
    in_specs = [pl.BlockSpec((batch_tile, C), lambda i: (i, 0)),
                pl.BlockSpec((batch_tile, C), lambda i: (i, 0))]
    if use_reg:
        ins.append(features)
        in_specs.append(pl.BlockSpec((batch_tile, D), lambda i: (i, 0)))
        out_cols = 2                      # col 0: ce partials, col 1: reg partials
    else:
        out_cols = 1
    out_shape = jax.ShapeDtypeStruct((B, out_cols), jnp.float32)
    out_spec = pl.BlockSpec((batch_tile, out_cols), lambda i: (i, 0))

    kernel = functools.partial(
        _multi_loss_kernel,
        smooth=smooth, eps=eps, class_num=class_num, regularization=regularization,
        batch=B, batch_tile=batch_tile,
    )

    result = pl.pallas_call(
        kernel,
        out_shape=out_shape,
        grid_spec=pltpu.PrefetchScalarGridSpec(
            num_scalar_prefetch=0,
            grid=grid,
            in_specs=in_specs,
            out_specs=out_spec,
        ),
        compiler_params=pltpu.CompilerParams(
            dimension_semantics=("parallel",),   # no carried state -> megacore OK
            vmem_limit_bytes=32 << 20,           # safe on v5e/v6e/v7x
        ),
    )(*ins)

    if use_reg:
        loss = jnp.sum(result[:, 0]) / jnp.float32(B) \
            + jnp.float32(lam) * jnp.sum(result[:, 1]) / jnp.float32(B * D)
    else:
        loss = jnp.sum(result) / jnp.float32(B)
    return loss


def _multi_loss_ref(features, output, target, *, class_num=21, smooth=0, eps=0.0,
                    regularization=0, lam=0.5):
    """Pure-JAX reference mirroring the torch module."""
    output = output.astype(jnp.float32)
    target_f = target.astype(jnp.float32)
    if smooth == 0:
        soft = target_f
    else:
        total = target_f.sum(axis=1, keepdims=True)
        noise = (1.0 - target_f) / class_num * total
        soft = (1.0 - eps) * target_f + eps * noise
    logpt = jax.nn.log_softmax(output, axis=1)
    loss = -(logpt * soft).sum(axis=1)
    if regularization == 1:
        loss = loss + lam * jnp.mean(jnp.abs(jnp.abs(features) - 1.0))
    elif regularization == 2:
        loss = loss + lam * jnp.mean((jnp.abs(features) - 1.0) ** 2)
    return loss.mean()


if __name__ == "__main__":
    key = jax.random.PRNGKey(0)
    k1, k2, k3 = jax.random.split(key, 3)

    # small shapes: batch=16, class_num=21, feature dim=32
    B, C, D = 16, 21, 32
    output = jax.random.normal(k1, (B, C), dtype=jnp.float32)
    labels = jax.random.randint(k2, (B,), 0, C)
    target = jax.nn.one_hot(labels, C, dtype=jnp.float32)
    features = jax.random.normal(k3, (B, D), dtype=jnp.float32)

    # 1) default config: smooth=0, eps=0.0, regularization=0, lam=0.5
    loss = multi_loss(features, output, target,
                      class_num=C, smooth=0, eps=0.0, regularization=0, lam=0.5)
    loss = jax.block_until_ready(loss)
    ref = _multi_loss_ref(features, output, target,
                          class_num=C, smooth=0, eps=0.0, regularization=0, lam=0.5)
    assert jnp.allclose(loss, ref, atol=1e-5, rtol=1e-5), (loss, ref)

    # 2) smooth + L2 regularization branch
    loss2 = multi_loss(features, output, target,
                       class_num=C, smooth=1, eps=0.1, regularization=2, lam=0.5)
    loss2 = jax.block_until_ready(loss2)
    ref2 = _multi_loss_ref(features, output, target,
                           class_num=C, smooth=1, eps=0.1, regularization=2, lam=0.5)
    assert jnp.allclose(loss2, ref2, atol=1e-5, rtol=1e-5), (loss2, ref2)

    # 3) non-multiple batch + multi-tile grid + L1 regularization (masking path)
    B3 = 200
    k4, k5, k6 = jax.random.split(jax.random.PRNGKey(1), 3)
    output3 = jax.random.normal(k4, (B3, C), dtype=jnp.float32)
    target3 = jax.nn.one_hot(jax.random.randint(k5, (B3,), 0, C), C, dtype=jnp.float32)
    features3 = jax.random.normal(k6, (B3, D), dtype=jnp.float32)
    loss3 = multi_loss(features3, output3, target3,
                       class_num=C, smooth=0, eps=0.0, regularization=1, lam=0.5,
                       batch_tile=128)
    loss3 = jax.block_until_ready(loss3)
    ref3 = _multi_loss_ref(features3, output3, target3,
                           class_num=C, smooth=0, eps=0.0, regularization=1, lam=0.5)
    assert jnp.allclose(loss3, ref3, atol=1e-5, rtol=1e-5), (loss3, ref3)

    print("KERNEL_OK")
</pallas_src>

<mosaic_0001>
module attributes {stable_mosaic.version = 11 : i64} {
  func.func @_multi_loss_kernel(%arg0: i32, %arg1: memref<16x21xf32, #tpu.memory_space<vmem>>, %arg2: memref<16x21xf32, #tpu.memory_space<vmem>>, %arg3: memref<16x1xf32, #tpu.memory_space<vmem>>) attributes {dimension_semantics = [#tpu.dimension_semantics<parallel>], iteration_bounds = array<i64: 1>, scalar_prefetch = 0 : i64, scratch_operands = 0 : i64, tpu.core_type = #tpu.core_type<tc>, window_params = [{transform_indices = @transform_0, window_bounds = array<i64: 16, 21>}, {transform_indices = @transform_1, window_bounds = array<i64: 16, 21>}, {transform_indices = @transform_2, window_bounds = array<i64: 16, 1>}]} {
    %c0 = arith.constant 0 : index
    %c0_0 = arith.constant 0 : index
    %0 = vector.load %arg1[%c0, %c0_0] : memref<16x21xf32, #tpu.memory_space<vmem>>, vector<16x21xf32>
    %c0_1 = arith.constant 0 : index
    %c0_2 = arith.constant 0 : index
    %1 = vector.load %arg2[%c0_1, %c0_2] : memref<16x21xf32, #tpu.memory_space<vmem>>, vector<16x21xf32>
    %c16_i32 = arith.constant 16 : i32
    %2 = arith.muli %arg0, %c16_i32 : i32
    %3 = tpu.iota {dimensions = array<i32: 0>} : vector<16x1xi32>
    %4 = vector.broadcast %2 : i32 to vector<16x1xi32>
    %5 = arith.addi %3, %4 : vector<16x1xi32>
    %c16_i32_3 = arith.constant 16 : i32
    %6 = vector.broadcast %c16_i32_3 : i32 to vector<16x1xi32>
    %7 = arith.cmpi slt, %5, %6 : vector<16x1xi32>
    %cst = arith.constant dense<0xFF800000> : vector<16xf32>
    %8 = vector.multi_reduction <maximumf>, %0, %cst [1] : vector<16x21xf32> to vector<16xf32>
    %9 = vector.shape_cast %8 : vector<16xf32> to vector<16x1xf32>
    %10 = vector.broadcast %9 : vector<16x1xf32> to vector<16x21xf32>
    %11 = arith.subf %0, %10 : vector<16x21xf32>
    %12 = math.exp %11 : vector<16x21xf32>
    %cst_4 = arith.constant dense<0.000000e+00> : vector<16xf32>
    %13 = vector.multi_reduction <add>, %12, %cst_4 [1] : vector<16x21xf32> to vector<16xf32>
    %14 = vector.shape_cast %13 : vector<16xf32> to vector<16x1xf32>
    %15 = math.log %14 : vector<16x1xf32>
    %cst_5 = arith.constant dense<0.000000e+00> : vector<16xf32>
    %16 = vector.multi_reduction <add>, %1, %cst_5 [1] : vector<16x21xf32> to vector<16xf32>
    %17 = vector.shape_cast %16 : vector<16xf32> to vector<16x1xf32>
    %18 = arith.mulf %1, %11 : vector<16x21xf32>
    %cst_6 = arith.constant dense<0.000000e+00> : vector<16xf32>
    %19 = vector.multi_reduction <add>, %18, %cst_6 [1] : vector<16x21xf32> to vector<16xf32>
    %20 = vector.shape_cast %19 : vector<16xf32> to vector<16x1xf32>
    %21 = arith.mulf %15, %17 : vector<16x1xf32>
    %22 = arith.subf %21, %20 : vector<16x1xf32>
    %cst_7 = arith.constant 0.000000e+00 : f32
    %23 = vector.broadcast %cst_7 : f32 to vector<16x1xf32>
    %24 = arith.select %7, %22, %23 : vector<16x1xi1>, vector<16x1xf32>
    %c0_8 = arith.constant 0 : index
    %c0_9 = arith.constant 0 : index
    %25 = vector.load %arg3[%c0_8, %c0_9] : memref<16x1xf32, #tpu.memory_space<vmem>>, vector<16x1xf32>
    tpu.vector_store %arg3[%c0_8, %c0_9], %24 {strides = array<i32>} : memref<16x1xf32, #tpu.memory_space<vmem>>, vector<16x1xf32>,
    return
  }
  func.func @transform_0(%arg0: i32) -> (i32, i32) {
    %c0_i32 = arith.constant 0 : i32
    %c0_i32_0 = arith.constant 0 : i32
    return %arg0, %c0_i32 : i32, i32
  }
  func.func @transform_1(%arg0: i32) -> (i32, i32) {
    %c0_i32 = arith.constant 0 : i32
    %c0_i32_0 = arith.constant 0 : i32
    return %arg0, %c0_i32 : i32, i32
  }
  func.func @transform_2(%arg0: i32) -> (i32, i32) {
    %c0_i32 = arith.constant 0 : i32
    %c0_i32_0 = arith.constant 0 : i32
    return %arg0, %c0_i32 : i32, i32
  }
}

</mosaic_0001>

<bundles_post_ra>
// kernel: tpu_custom_call.1
= control target key start
LH: loop header
LB: loop body
LE: loop exit
PB: predicated region body
PF: predicated region fallthrough
CT: control target
= control target key end

     0   :  { %7 = vsyncpa [#allocation3], 0  ;;  %s211_s0 = inlined_call_operand.hbm [shape: f32[16,21], index: 0, kind: input, shape index: {}]   ;;  %s212_s1 = inlined_call_operand.hbm [shape: f32[16,21], index: 1, kind: input, shape index: {}]   ;;  %s213_s2 = inlined_call_operand.vmem [shape: f32[16,1], index: 2, kind: output, shape index: {}]  }
   0x1   :  { %s13_s11 = sshll.u32 %s211_s0, 4  ;;  %s14_s11 = int_to_ptr.hbm [resolvable:$true] %s13_s11 }
   0x2   :  { %8 = vsyncpa [#allocation5], 0  ;;  %s172_s12 = smov [#allocation2]   ;;  %s26_s16 = sshll.u32 %s212_s1, 4  ;;  %s27_s16 = int_to_ptr.hbm [resolvable:$true] %s26_s16 }
   0x3   :  { %s15_s13 = sshll.u32 %s172_s12, 4  ;;  %s173_s17 = smov 128   ;;  %s16_s13 = int_to_ptr.vmem [resolvable:$true] %s15_s13 }
   0x4   :  { %s174_s18 = smov 8   ;;  %s175_s19 = smov [#allocation4]  }
   0x5   :  { %21 = dma.hbm_to_vmem [thread:$0]  %s14_s11, 256, %s16_s13, [#allocation3], %s173_s17, %s173_s17, %s174_s18  }
   0x6   :  { %s28_s20 = sshll.u32 %s175_s19, 4  ;;  %s29_s20 = int_to_ptr.vmem [resolvable:$true] %s28_s20 }
   0x7   :  { %34 = dma.hbm_to_vmem [thread:$0]  %s27_s16, 256, %s29_s20, [#allocation5], %s173_s17, %s173_s17, %s174_s18  }
   0x8   :  { %168 = dma.done.wait [#allocation3], 256  }
   0x9   :  { %169 = vsyncadd [#allocation3], 4294967040 }
   0xa   :  { %170 = dma.done.wait [#allocation5], 256  }
   0xb   :  { %171 = vsyncadd [#allocation5], 4294967040  ;;  %vm56_vm0 = vcmask 171008   ;;  %v43_v0 = vld [vmem:[#allocation2] sm:$0xff]  ;;  %v44_v2 = vld [vmem:[#allocation2 + $0x8] sm:$0xff]  ;;  %vm99_vm1 = vcmask 7168  }
   0xc   :  { %v57_v1 = vsel %vm56_vm0, %v43_v0, -inf  ;;  %v60_v3 = vsel %vm56_vm0, %v44_v2, -inf  ;;  %v45_v4 = vld [vmem:[#allocation4] sm:$0xff]  ;;  %v46_v6 = vld [vmem:[#allocation4 + $0x8] sm:$0xff] }
   0xd   :  { %58 = vmax.xlane.f32.xlu0 %v57_v1  ;;  %v79_v5 = vsel %vm56_vm0, %v45_v4, 0.0  ;;  %v82_v7 = vsel %vm56_vm0, %v46_v6, 0.0 }
   0xe   :  { %80 = vadd.xlane.f32.xlu2 %v79_v5 }
  0x15   :  { %61 = vmax.xlane.f32.xlu0 %v60_v3 }
  0x16   :  { %83 = vadd.xlane.f32.xlu2 %v82_v7 }
  0x80   :  { %v59_v8 = vpop.xlane.xlu0 %58 }
  0x81   :  { %v63_v9 = vsub.f32 %v43_v0, %v59_v8  ;;  %v81_v23 = vpop.xlane.xlu2 %80 }
  0x83   :  { %v65_v10 = vmul.f32 1.442695, %v63_v9  ;;  %v85_v11 = vmul.f32 %v63_v9, %v45_v4 }
  0x85   :  { %112 = vpow2.f32 %v65_v10  ;;  %v87_v12 = vsel %vm56_vm0, %v85_v11, 0.0 }
  0x86   :  { %88 = vadd.xlane.f32.xlu0 %v87_v12 }
  0x88   :  { %v62_v13 = vpop.xlane.xlu0 %61 }
  0x89   :  { %v64_v14 = vsub.f32 %v44_v2, %v62_v13  ;;  %v84_v31 = vpop.xlane.xlu2 %83 }
  0x8b   :  { %v113_v15 = vpop.eup %112  ;;  %v67_v16 = vmul.f32 1.442695, %v64_v14  ;;  %v86_v20 = vmul.f32 %v64_v14, %v46_v6 }
  0x8c   :  { %v69_v17 = vsel %vm56_vm0, %v113_v15, 0.0 }
  0x8d   :  { %114 = vpow2.f32 %v67_v16  ;;  %70 = vadd.xlane.f32.xlu1 %v69_v17  ;;  %v90_v21 = vsel %vm56_vm0, %v86_v20, 0.0 }
  0x93   :  { %v115_v18 = vpop.eup %114 }
  0x94   :  { %v72_v19 = vsel %vm56_vm0, %v115_v18, 0.0 }
  0x95   :  { %73 = vadd.xlane.f32.xlu1 %v72_v19 }
  0x9d   :  { %91 = vadd.xlane.f32.xlu1 %v90_v21 }
  0xf9   :  { %v89_v28 = vpop.xlane.xlu0 %88 }
 0x100   :  { %v71_v22 = vpop.xlane.xlu1 %70 }
 0x101   :  { %116 = vlog2.f32 %v71_v22 }
 0x107   :  { %v117_v24 = vpop.eup %116 }
 0x108   :  { %v76_v25 = vmul.f32 0.6931472, %v117_v24  ;;  %v74_v26 = vpop.xlane.xlu1 %73 }
 0x109   :  { %118 = vlog2.f32 %v74_v26 }
 0x10a   :  { %v93_v27 = vmul.f32 %v81_v23, %v76_v25 }
 0x10c   :  { %v95_v29 = vsub.f32 %v93_v27, %v89_v28 }
 0x10e   :  { %100 = vst.msk [vmem:[%s213_s2] sm:$0xff] %vm99_vm1, %v95_v29 }
 0x10f   :  { %v119_v30 = vpop.eup %118 }
 0x110   :  { %v78_v32 = vmul.f32 0.6931472, %v119_v30  ;;  %v92_v34 = vpop.xlane.xlu1 %91 }
 0x112   :  { %v94_v33 = vmul.f32 %v84_v31, %v78_v32 }
 0x114   :  { %v96_v35 = vsub.f32 %v94_v33, %v92_v34 }
 0x116   :  { %101 = vst.msk [vmem:[%s213_s2 + $0x8] sm:$0xff] %vm99_vm1, %v96_v35 }
 0x117   :  { %106 = vsyncpa [#allocation3], 1 }
 0x118   :  { %107 = vsyncpa [#allocation5], 1 }

</bundles_post_ra>
